<compile_context>
chip_gen: v5e
topology: v5e:2x2
jax: 0.10.0
libtpu: 0.0.40
codegen_flags: <defaults>
</compile_context>

<pallas_src>
import jax
import jax.numpy as jnp
from jax.experimental import pallas as pl
from jax.experimental.pallas import tpu as pltpu

LANE = 128  # TPU lane width; feature dims here (4/10/10/3) all fit in one lane group
SUBLANE = 8


def _round_up(n, m):
    return ((n + m - 1) // m) * m


def pack_params(params, dims):
    """Pack weights+biases into a single lane-padded (R, 128) f32 slab.

    Weights must be stored [in, out] (transposed vs. torch.nn.Linear.weight),
    biases as (1, out).  w2 / w3 are padded to full (128, 128) MXU tiles.
    Every piece starts on an 8-row (sublane) boundary.
    Returns (slab, row_offsets).
    """
    fin, h1, h2, fout = dims
    w1, b1, w2, b2, w3, b3 = [jnp.asarray(p, jnp.float32) for p in params]
    assert w1.shape == (fin, h1) and b1.shape == (1, h1), (w1.shape, b1.shape)
    assert w2.shape == (h1, h2) and b2.shape == (1, h2), (w2.shape, b2.shape)
    assert w3.shape == (h2, fout) and b3.shape == (1, fout), (w3.shape, b3.shape)

    def pad_piece(arr, rows):
        k, n = arr.shape
        rows = _round_up(rows, SUBLANE)  # sublane-aligned start for the next piece
        return jnp.pad(arr, ((0, rows - k), (0, LANE - n)))

    pieces = [
        ("w1", pad_piece(w1, fin)),     # (8,   128)
        ("b1", pad_piece(b1, 1)),       # (8,   128)
        ("w2", pad_piece(w2, LANE)),    # (128, 128) full MXU tile
        ("b2", pad_piece(b2, 1)),       # (8,   128)
        ("w3", pad_piece(w3, LANE)),    # (128, 128) full MXU tile
        ("b3", pad_piece(b3, 1)),       # (8,   128)
    ]
    offs, r, rows = {}, 0, []
    for name, arr in pieces:
        offs[name] = r
        rows.append(arr)
        r += arr.shape[0]
    slab = jnp.concatenate(rows, axis=0)    # (288, 128) f32 ~ 147 KB
    return slab, offs


def _make_mlp_kernel(dims, offs):
    fin, h1, h2, fout = dims
    w1_o, b1_o = offs["w1"], offs["b1"]
    w2_o, b2_o = offs["w2"], offs["b2"]
    w3_o, b3_o = offs["w3"], offs["b3"]

    def kernel(x_ref, p_ref, ot_ref):
        x = x_ref[...]                                  # (tb, fin)
        w1 = p_ref[w1_o:w1_o + fin, :]                  # (fin, 128), zero-padded lanes
        b1 = p_ref[b1_o:b1_o + 1, :]                    # (1, 128)
        w2 = p_ref[w2_o:w2_o + LANE, :]                 # (128, 128), zero-padded
        b2 = p_ref[b2_o:b2_o + 1, :]
        w3 = p_ref[w3_o:w3_o + LANE, :]                 # (128, 128), zero-padded
        b3 = p_ref[b3_o:b3_o + 1, :]

        # MXU matmuls; zero-padded lanes/rows contribute 0 so padding never leaks.
        a1 = jnp.maximum(jnp.dot(x, w1, preferred_element_type=jnp.float32) + b1, 0.0)
        a2 = jnp.maximum(jnp.dot(a1, w2, preferred_element_type=jnp.float32) + b2, 0.0)
        a3 = jnp.dot(a2, w3, preferred_element_type=jnp.float32) + b3   # (tb, 128)

        # Lane-dense store: put the batch on the 128-lane axis.
        ot_ref[...] = jnp.transpose(a3)[:fout, :].astype(ot_ref.dtype)  # (fout, tb)

    return kernel


def _choose_tb(B, block_b):
    """Batch tile size: large lane/sublane-aligned tiles, >=2 tiles when worth it."""
    assert block_b % LANE == 0
    if B > block_b:
        return block_b
    if B >= 256:
        # Split into two tiles so ("parallel",) can use both TensorCores on v7x.
        return _round_up(-(-B // 2), LANE)
    return B  # single tile == full batch (block shape equals full array dims)


def mlp_forward(x, slab, offs, dims, *, block_b=1024):
    """x: (B, in_features) f32; slab/offs: packed params from pack_params."""
    fin, h1, h2, fout = dims
    B = x.shape[0]
    tb = _choose_tb(B, block_b)
    grid = (pl.cdiv(B, tb),)  # ragged tail handled by partial edge blocks (no jnp.pad)

    kernel = _make_mlp_kernel(dims, offs)
    out_t = pl.pallas_call(
        kernel,
        out_shape=jax.ShapeDtypeStruct((fout, B), jnp.float32),
        grid=grid,
        in_specs=[
            pl.BlockSpec((tb, fin), lambda i: (i, 0)),       # batch-tiled activations
            pl.BlockSpec(slab.shape, lambda i: (0, 0)),      # resident packed params
        ],
        out_specs=pl.BlockSpec((fout, tb), lambda i: (0, i)),  # lane-dense (batch on lanes)
        compiler_params=pltpu.CompilerParams(
            dimension_semantics=("parallel",),               # megacore sharding on v7x
        ),
    )(x, slab)
    return out_t.T  # (B, fout), matches the PyTorch module's output layout


def init_params(key, in_features=4, h1=10, h2=10, out_features=3):
    # Deterministic init mimicking torch.nn.Linear's U(-1/sqrt(fan_in), 1/sqrt(fan_in)).
    def linear(k, fan_in, fan_out):
        kw, kb = jax.random.split(k)
        bound = 1.0 / jnp.sqrt(fan_in)
        w = jax.random.uniform(kw, (fan_in, fan_out), jnp.float32, -bound, bound)
        b = jax.random.uniform(kb, (1, fan_out), jnp.float32, -bound, bound)
        return w, b

    k1, k2, k3 = jax.random.split(key, 3)
    w1, b1 = linear(k1, in_features, h1)
    w2, b2 = linear(k2, h1, h2)
    w3, b3 = linear(k3, h2, out_features)
    return (w1, b1, w2, b2, w3, b3)


def reference_forward(x, params):
    w1, b1, w2, b2, w3, b3 = params
    a1 = jnp.maximum(x @ w1 + b1, 0.0)
    a2 = jnp.maximum(a1 @ w2 + b2, 0.0)
    return a2 @ w3 + b3


if __name__ == "__main__":
    key = jax.random.PRNGKey(0)
    kx, kp = jax.random.split(key)

    B, in_features, h1, h2, out_features = 8, 4, 10, 10, 3
    dims = (in_features, h1, h2, out_features)

    x = jax.random.normal(kx, (B, in_features), dtype=jnp.float32)
    params = init_params(kp, in_features, h1, h2, out_features)
    slab, offs = pack_params(params, dims)

    out = mlp_forward(x, slab, offs, dims)
    out = jax.block_until_ready(out)

    ref = reference_forward(x, params)
    assert out.shape == (B, out_features)
    assert jnp.allclose(out, ref, atol=1e-5, rtol=1e-5)

    print("KERNEL_OK")
</pallas_src>

<mosaic_0001>
module attributes {stable_mosaic.version = 11 : i64} {
  func.func @kernel(%arg0: i32, %arg1: memref<8x4xf32, #tpu.memory_space<vmem>>, %arg2: memref<288x128xf32, #tpu.memory_space<vmem>>, %arg3: memref<3x8xf32, #tpu.memory_space<vmem>>) attributes {dimension_semantics = [#tpu.dimension_semantics<parallel>], iteration_bounds = array<i64: 1>, scalar_prefetch = 0 : i64, scratch_operands = 0 : i64, tpu.core_type = #tpu.core_type<tc>, window_params = [{transform_indices = @transform_0, window_bounds = array<i64: 8, 4>}, {pipeline_mode = #tpu.pipeline_mode<synchronous>, transform_indices = @transform_1, window_bounds = array<i64: 288, 128>}, {transform_indices = @transform_2, window_bounds = array<i64: 3, 8>}]} {
    %c0 = arith.constant 0 : index
    %c0_0 = arith.constant 0 : index
    %0 = vector.load %arg1[%c0, %c0_0] : memref<8x4xf32, #tpu.memory_space<vmem>>, vector<8x4xf32>
    %c0_1 = arith.constant 0 : index
    %c0_2 = arith.constant 0 : index
    %1 = vector.load %arg2[%c0_1, %c0_2] : memref<288x128xf32, #tpu.memory_space<vmem>>, vector<4x128xf32>
    %c8 = arith.constant 8 : index
    %c0_3 = arith.constant 0 : index
    %2 = vector.load %arg2[%c8, %c0_3] : memref<288x128xf32, #tpu.memory_space<vmem>>, vector<1x128xf32>
    %c16 = arith.constant 16 : index
    %c0_4 = arith.constant 0 : index
    %3 = vector.load %arg2[%c16, %c0_4] : memref<288x128xf32, #tpu.memory_space<vmem>>, vector<128x128xf32>
    %c144 = arith.constant 144 : index
    %c0_5 = arith.constant 0 : index
    %4 = vector.load %arg2[%c144, %c0_5] : memref<288x128xf32, #tpu.memory_space<vmem>>, vector<1x128xf32>
    %c152 = arith.constant 152 : index
    %c0_6 = arith.constant 0 : index
    %5 = vector.load %arg2[%c152, %c0_6] : memref<288x128xf32, #tpu.memory_space<vmem>>, vector<128x128xf32>
    %c280 = arith.constant 280 : index
    %c0_7 = arith.constant 0 : index
    %6 = vector.load %arg2[%c280, %c0_7] : memref<288x128xf32, #tpu.memory_space<vmem>>, vector<1x128xf32>
    %cst = arith.constant dense<0.000000e+00> : vector<8x128xf32>
    %7 = tpu.matmul %0, %1, %cst {dimension_numbers = #tpu.dot_dimension_numbers<[1], [0], [0], [1], [0, 0, 1, 1], [], []>} : vector<8x4xf32>, vector<4x128xf32>, vector<8x128xf32> -> vector<8x128xf32>
    %8 = vector.broadcast %2 : vector<1x128xf32> to vector<8x128xf32>
    %9 = arith.addf %7, %8 : vector<8x128xf32>
    %cst_8 = arith.constant 0.000000e+00 : f32
    %10 = vector.broadcast %cst_8 : f32 to vector<8x128xf32>
    %11 = arith.maximumf %9, %10 : vector<8x128xf32>
    %cst_9 = arith.constant dense<0.000000e+00> : vector<8x128xf32>
    %12 = tpu.matmul %11, %3, %cst_9 {dimension_numbers = #tpu.dot_dimension_numbers<[1], [0], [0], [1], [0, 0, 1, 1], [], []>} : vector<8x128xf32>, vector<128x128xf32>, vector<8x128xf32> -> vector<8x128xf32>
    %13 = vector.broadcast %4 : vector<1x128xf32> to vector<8x128xf32>
    %14 = arith.addf %12, %13 : vector<8x128xf32>
    %cst_10 = arith.constant 0.000000e+00 : f32
    %15 = vector.broadcast %cst_10 : f32 to vector<8x128xf32>
    %16 = arith.maximumf %14, %15 : vector<8x128xf32>
    %cst_11 = arith.constant dense<0.000000e+00> : vector<8x128xf32>
    %17 = tpu.matmul %16, %5, %cst_11 {dimension_numbers = #tpu.dot_dimension_numbers<[1], [0], [0], [1], [0, 0, 1, 1], [], []>} : vector<8x128xf32>, vector<128x128xf32>, vector<8x128xf32> -> vector<8x128xf32>
    %18 = vector.broadcast %6 : vector<1x128xf32> to vector<8x128xf32>
    %19 = arith.addf %17, %18 : vector<8x128xf32>
    %20 = tpu.transpose %19, [1, 0] : vector<8x128xf32> -> vector<128x8xf32>
    %21 = vector.extract_strided_slice %20 {offsets = [0, 0], sizes = [3, 8], strides = [1, 1]} : vector<128x8xf32> to vector<3x8xf32>
    %c0_12 = arith.constant 0 : index
    %c0_13 = arith.constant 0 : index
    %22 = vector.load %arg3[%c0_12, %c0_13] : memref<3x8xf32, #tpu.memory_space<vmem>>, vector<3x8xf32>
    tpu.vector_store %arg3[%c0_12, %c0_13], %21 {strides = array<i32>} : memref<3x8xf32, #tpu.memory_space<vmem>>, vector<3x8xf32>,
    return
  }
  func.func @transform_0(%arg0: i32) -> (i32, i32) {
    %c0_i32 = arith.constant 0 : i32
    %c0_i32_0 = arith.constant 0 : i32
    return %arg0, %c0_i32 : i32, i32
  }
  func.func @transform_1(%arg0: i32) -> (i32, i32) {
    %c0_i32 = arith.constant 0 : i32
    %c0_i32_0 = arith.constant 0 : i32
    %c0_i32_1 = arith.constant 0 : i32
    return %c0_i32, %c0_i32_0 : i32, i32
  }
  func.func @transform_2(%arg0: i32) -> (i32, i32) {
    %c0_i32 = arith.constant 0 : i32
    %c0_i32_0 = arith.constant 0 : i32
    return %c0_i32, %arg0 : i32, i32
  }
}

</mosaic_0001>

<bundles_post_ra>
// kernel: tpu_custom_call.1
= control target key start
LH: loop header
LB: loop body
LE: loop exit
PB: predicated region body
PF: predicated region fallthrough
CT: control target
= control target key end

     0   :  { %7 = vsyncpa [#allocation3], 0  ;;  %s279_s0 = inlined_call_operand.vmem [shape: f32[8,4], index: 0, kind: input, shape index: {}]   ;;  %s280_s1 = inlined_call_operand.hbm [shape: f32[288,128], index: 1, kind: input, shape index: {}]   ;;  %s281_s2 = inlined_call_operand.hbm [shape: f32[3,8], index: 2, kind: output, shape index: {}]  }
   0x1   :  { %8 = vsyncpa [#allocation4], 0  ;;  %s15_s11 = sshll.u32 %s280_s1, 4  ;;  %s251_s12 = smov [#allocation2]   ;;  %s16_s11 = int_to_ptr.hbm [resolvable:$true] %s15_s11 }
   0x2   :  { %s17_s13 = sshll.u32 %s251_s12, 4  ;;  %s252_s14 = smov 128   ;;  %s18_s13 = int_to_ptr.vmem [resolvable:$true] %s17_s13 }
   0x3   :  { %s253_s15 = smov 8  }
   0x4   :  { %23 = dma.hbm_to_vmem [thread:$0]  %s16_s11, 4608, %s18_s13, [#allocation3], %s252_s14, %s252_s14, %s253_s15  }
   0x5   :  { %247 = dma.done.wait [#allocation3], 4608  }
   0x6   :  { %248 = vsyncadd [#allocation3], 4294962688  ;;  %vm70_vm0 = vcmask 1043456   ;;  %vm66_vm1 = vcmask 31744   ;;  %v29_v0 = vld [vmem:[#allocation2] sm:$0xf] }
   0x7   :  { %v28_v1 = vld [vmem:[%s279_s0] sm:$0xff]  ;;  %v46_v2 = vld [vmem:[#allocation2 + $0x88] sm:$0xff]  ;;  %189 = vmatpush.msk.msra.mxu0 %vm70_vm0, %v29_v0  ;;  %v44_v4 = vld [vmem:[#allocation2 + $0x78] sm:$0xff]  ;;  %s254_s0 = smov [#allocation5]   ;;  %s179_s20 = sshll.u32 %s281_s2, 4  ;;  %vm170_vm2 = vcmask 59392   ;;  %s180_s20 = int_to_ptr.hbm [resolvable:$true] %s179_s20 }
   0x8   :  { %96 = vmatpush.msra.mxu1 %v46_v2  ;;  %v45_v3 = vld [vmem:[#allocation2 + $0x80] sm:$0xff]  ;;  %190 = vmatmul.msk.f32.vlgmr.msra.gmra.mxu0 %vm66_vm1, %v28_v1  ;;  %v43_v5 = vld [vmem:[#allocation2 + $0x70] sm:$0xff]  ;;  %v42_v6 = vld [vmem:[#allocation2 + $0x68] sm:$0xff]  ;;  %s177_s1 = sshll.u32 %s254_s0, 4  ;;  %s178_s1 = int_to_ptr.vmem [resolvable:$true] %s177_s1 }
   0x9   :  { %v41_v7 = vld [vmem:[#allocation2 + $0x60] sm:$0xff]  ;;  %v40_v8 = vld [vmem:[#allocation2 + $0x58] sm:$0xff]  ;;  %v39_v9 = vld [vmem:[#allocation2 + $0x50] sm:$0xff] }
   0xa   :  { %97 = vmatpush.msra.mxu1 %v45_v3  ;;  %v38_v10 = vld [vmem:[#allocation2 + $0x48] sm:$0xff]  ;;  %v37_v11 = vld [vmem:[#allocation2 + $0x40] sm:$0xff]  ;;  %v36_v12 = vld [vmem:[#allocation2 + $0x38] sm:$0xff] }
   0xb   :  { %v35_v13 = vld [vmem:[#allocation2 + $0x30] sm:$0xff]  ;;  %v34_v14 = vld [vmem:[#allocation2 + $0x28] sm:$0xff]  ;;  %v33_v15 = vld [vmem:[#allocation2 + $0x20] sm:$0xff] }
   0xc   :  { %98 = vmatpush.msra.mxu1 %v44_v4  ;;  %v32_v16 = vld [vmem:[#allocation2 + $0x18] sm:$0xff]  ;;  %v31_v17 = vld [vmem:[#allocation2 + $0x10] sm:$0xff]  ;;  %v62_v19 = vld [vmem:[#allocation2 + $0x108] sm:$0xff] }
   0xd   :  { %v63_v18 = vld [vmem:[#allocation2 + $0x110] sm:$0xff]  ;;  %v61_v20 = vld [vmem:[#allocation2 + $0x100] sm:$0xff]  ;;  %v60_v21 = vld [vmem:[#allocation2 + $0xf8] sm:$0xff] }
   0xe   :  { %99 = vmatpush.msra.mxu1 %v43_v5  ;;  %118 = vmatpush.msra.mxu2 %v63_v18  ;;  %v59_v22 = vld [vmem:[#allocation2 + $0xf0] sm:$0xff]  ;;  %v58_v23 = vld [vmem:[#allocation2 + $0xe8] sm:$0xff]  ;;  %v57_v24 = vld [vmem:[#allocation2 + $0xe0] sm:$0xff] }
   0xf   :  { %v56_v25 = vld [vmem:[#allocation2 + $0xd8] sm:$0xff]  ;;  %v55_v26 = vld [vmem:[#allocation2 + $0xd0] sm:$0xff]  ;;  %v54_v27 = vld [vmem:[#allocation2 + $0xc8] sm:$0xff] }
  0x10   :  { %100 = vmatpush.msra.mxu1 %v42_v6  ;;  %119 = vmatpush.msra.mxu2 %v62_v19  ;;  %v53_v28 = vld [vmem:[#allocation2 + $0xc0] sm:$0xff]  ;;  %v52_v29 = vld [vmem:[#allocation2 + $0xb8] sm:$0xff]  ;;  %v51_v30 = vld [vmem:[#allocation2 + $0xb0] sm:$0xff] }
  0x11   :  { %v196_v31 = vld [vmem:[#allocation2 + $0x8] ss:$0 sm:$0xff]  ;;  %v49_v36 = vld [vmem:[#allocation2 + $0xa0] sm:$0xff]  ;;  %v48_v37 = vld [vmem:[#allocation2 + $0x98] sm:$0xff] }
  0x12   :  { %101 = vmatpush.msra.mxu1 %v41_v7  ;;  %120 = vmatpush.msra.mxu2 %v61_v20  ;;  %v50_v35 = vld [vmem:[#allocation2 + $0xa8] sm:$0xff]  ;;  %v197_v38 = vld [vmem:[#allocation2 + $0x90] ss:$0 sm:$0xff]  ;;  %v198_v42 = vld [vmem:[#allocation2 + $0x118] ss:$0 sm:$0xff] }
  0x14   :  { %102 = vmatpush.msra.mxu1 %v40_v8  ;;  %121 = vmatpush.msra.mxu2 %v60_v21 }
  0x16   :  { %103 = vmatpush.msra.mxu1 %v39_v9  ;;  %122 = vmatpush.msra.mxu2 %v59_v22 }
  0x18   :  { %104 = vmatpush.msra.mxu1 %v38_v10  ;;  %123 = vmatpush.msra.mxu2 %v58_v23 }
  0x1a   :  { %105 = vmatpush.msra.mxu1 %v37_v11  ;;  %124 = vmatpush.msra.mxu2 %v57_v24 }
  0x1c   :  { %106 = vmatpush.msra.mxu1 %v36_v12  ;;  %125 = vmatpush.msra.mxu2 %v56_v25 }
  0x1e   :  { %107 = vmatpush.msra.mxu1 %v35_v13  ;;  %126 = vmatpush.msra.mxu2 %v55_v26 }
  0x20   :  { %108 = vmatpush.msra.mxu1 %v34_v14  ;;  %127 = vmatpush.msra.mxu2 %v54_v27 }
  0x22   :  { %109 = vmatpush.msra.mxu1 %v33_v15  ;;  %128 = vmatpush.msra.mxu2 %v53_v28 }
  0x24   :  { %110 = vmatpush.msra.mxu1 %v32_v16  ;;  %129 = vmatpush.msra.mxu2 %v52_v29 }
  0x26   :  { %111 = vmatpush.msra.mxu1 %v31_v17  ;;  %130 = vmatpush.msra.mxu2 %v51_v30 }
  0x28   :  { %131 = vmatpush.msra.mxu2 %v50_v35 }
  0x2a   :  { %132 = vmatpush.msra.mxu2 %v49_v36 }
  0x2c   :  { %133 = vmatpush.msra.mxu2 %v48_v37 }
  0x85   :  { %v91_v32 = vpop.f32.mrf.mxu0 }
  0x86   :  { %v92_v33 = vadd.f32 %v196_v31, %v91_v32 }
  0x88   :  { %v94_v34 = vmax.f32 %v92_v33, 0.0 }
  0x8a   :  { %112 = vmatmul.f32.vlgmr.msra.gmra.mxu1 %v94_v34 }
 0x107   :  { %v113_v39 = vpop.f32.mrf.mxu1 }
 0x108   :  { %v114_v40 = vadd.f32 %v197_v38, %v113_v39 }
 0x10a   :  { %v116_v41 = vmax.f32 %v114_v40, 0.0 }
 0x10c   :  { %134 = vmatmul.f32.vlgmr.msra.gmra.mxu2 %v116_v41 }
 0x18f   :  { %v135_v43 = vpop.f32.mrf.mxu2 }
 0x190   :  { %v136_v44 = vadd.f32 %v198_v42, %v135_v43 }
 0x192   :  { %138 = vxpose.xlu0.b32.start.end [1/1] (short) (narrow) %v136_v44, 8 }
 0x236   :  { %v154_v45 = vpop.trf.xlu0 }
 0x237   :  { %171 = vst.msk [vmem:[#allocation5] sm:$0x7] %vm170_vm2, %v154_v45 }
 0x238   :  { %182 = dma.vmem_to_hbm [thread:$0]  %s178_s1, 64, %s180_s20, [#allocation4]  }
 0x239   :  { %249 = dma.done.wait [#allocation4], 64  }
 0x23a   :  { %250 = vsyncadd [#allocation4], 4294967232 }
 0x23b   :  { %187 = vsyncpa [#allocation3], 1 }
 0x23c   :  { %188 = vsyncpa [#allocation4], 1 }

</bundles_post_ra>
